<compile_context>
chip_gen: v6e
topology: v6e:2x2x1
jax: 0.10.0
libtpu: 0.0.40
codegen_flags: <defaults>
</compile_context>

<pallas_src>
import functools

import jax
import jax.numpy as jnp
from jax.experimental import pallas as pl
from jax.experimental.pallas import tpu as pltpu


def _bn_kernel(x_ref, scale_ref, bias_ref, rm_ref,
               y_ref, sum_ref, sq_ref, *, hw_total, tile_hw):
    t = pl.program_id(1)

    x = x_ref[...].astype(jnp.float32)            # (1, C, T)
    d = x - rm_ref[...]                           # centered by running mean
    # y = (x - running_mean) * (w * rsqrt(var + eps)) + bias
    y_ref[...] = (d * scale_ref[...] + bias_ref[...]).astype(y_ref.dtype)

    # Mask padded tail lanes (only emitted when H*W doesn't divide tile_hw).
    if hw_total % tile_hw != 0:
        lane = jax.lax.broadcasted_iota(jnp.int32, d.shape, dimension=2)
        d = jnp.where(lane < (hw_total - t * tile_hw), d, 0.0)

    # Per-(batch, channel) partial sums, carried across the HW-tile grid axis.
    @pl.when(t == 0)
    def _():
        sum_ref[...] = jnp.zeros_like(sum_ref)
        sq_ref[...] = jnp.zeros_like(sq_ref)

    sum_ref[...] += jnp.sum(d, axis=2, keepdims=True)
    sq_ref[...] += jnp.sum(d * d, axis=2, keepdims=True)


def _choose_tile_hw(hw, c, dtype_bytes, vmem_tile_budget_bytes=32 << 20):
    """Largest HW-tile (multiple of 128, or full HW) whose x+y double-buffered
    tiles fit the VMEM budget."""
    itemsize = max(int(dtype_bytes), 4)           # kernel computes in f32
    denom = 4 * c * itemsize                      # (x + y) * 2 buffers
    max_tile = max(1, vmem_tile_budget_bytes // denom)
    if hw <= max_tile:
        return hw                                 # one tile = full spatial extent
    return min(hw, max(128, (max_tile // 128) * 128))


def _bn_pallas(x3, scale, bias, running_mean, *, tile_hw):
    """x3: (B, C, HW). Returns (y3, csum (B,C,1), csq (B,C,1)); sums are of
    (x - running_mean) and (x - running_mean)^2 over the HW axis."""
    b, c, hw = x3.shape
    n_t = pl.cdiv(hw, tile_hw)
    kernel = functools.partial(_bn_kernel, hw_total=hw, tile_hw=tile_hw)

    scale3 = scale.reshape(1, c, 1).astype(jnp.float32)
    bias3 = bias.reshape(1, c, 1).astype(jnp.float32)
    rm3 = running_mean.reshape(1, c, 1).astype(jnp.float32)

    y3, csum, csq = pl.pallas_call(
        kernel,
        out_shape=(
            jax.ShapeDtypeStruct((b, c, hw), x3.dtype),
            jax.ShapeDtypeStruct((b, c, 1), jnp.float32),
            jax.ShapeDtypeStruct((b, c, 1), jnp.float32),
        ),
        grid_spec=pltpu.PrefetchScalarGridSpec(
            num_scalar_prefetch=0,
            grid=(b, n_t),
            in_specs=[
                pl.BlockSpec((1, c, tile_hw), lambda bb, t: (bb, 0, t)),  # x
                pl.BlockSpec((1, c, 1), lambda bb, t: (0, 0, 0)),         # scale
                pl.BlockSpec((1, c, 1), lambda bb, t: (0, 0, 0)),         # bias
                pl.BlockSpec((1, c, 1), lambda bb, t: (0, 0, 0)),         # run mean
            ],
            out_specs=[
                pl.BlockSpec((1, c, tile_hw), lambda bb, t: (bb, 0, t)),  # y
                pl.BlockSpec((1, c, 1), lambda bb, t: (bb, 0, 0)),        # sum
                pl.BlockSpec((1, c, 1), lambda bb, t: (bb, 0, 0)),        # sumsq
            ],
        ),
        compiler_params=pltpu.CompilerParams(
            # batch axis is parallel (sharding across TCs on v7x); the HW-tile
            # axis carries the per-(b,c) accumulators -> arbitrary.
            dimension_semantics=("parallel", "arbitrary"),
            vmem_limit_bytes=48 * 1024 * 1024,
        ),
    )(x3, scale3, bias3, rm3)
    return y3, csum, csq


def async_batchnorm_forward(x_nchw, running_mean, running_var,
                            weight=None, bias=None, *,
                            eps=1e-5, momentum=0.9, training=True,
                            vmem_tile_budget_bytes=32 << 20):
    """Forward of AsyncBatchNorm (non-distributed, grad_acc_steps=1).

    x_nchw: (B, C, *spatial) float, PyTorch NC... convention.
    Returns (y, new_running_mean, new_running_var).
    """
    shape = x_nchw.shape
    b, c = int(shape[0]), int(shape[1])
    hw = 1
    for s in shape[2:]:
        hw *= int(s)
    if training and b == 1:
        raise NotImplementedError(
            "AsyncBatchNorm batch_size=1 requires syncing features instead of stats")

    if weight is None:
        weight = jnp.ones((c,), jnp.float32)     # affine=False path
    if bias is None:
        bias = jnp.zeros((c,), jnp.float32)

    rm = running_mean.astype(jnp.float32)
    rv = running_var.astype(jnp.float32)
    # Fold affine + running var: y = (x - rm) * scale + bias
    scale = weight.astype(jnp.float32) * jax.lax.rsqrt(rv + eps)

    x3 = x_nchw.reshape(b, c, hw)                 # free reshape, no transpose
    tile_hw = _choose_tile_hw(hw, c, jnp.dtype(x_nchw.dtype).itemsize,
                              vmem_tile_budget_bytes)

    y3, csum, csq = _bn_pallas(x3, scale, bias.astype(jnp.float32), rm,
                               tile_hw=tile_hw)
    y = y3.reshape(shape)

    if training:
        # _x_to_stats: mean & biased variance over (bs ...) per channel, then
        # running-stat momentum update (grad_acc_steps == 1 path).
        n = float(b * hw)
        s1 = jnp.sum(csum[:, :, 0], axis=0)       # sum(x - rm)      per channel
        s2 = jnp.sum(csq[:, :, 0], axis=0)        # sum((x - rm)^2)  per channel
        dmean = s1 / n
        batch_mean = rm + dmean
        batch_var = s2 / n - dmean * dmean        # shifted-data variance (stable)
        new_mean = running_mean * momentum + batch_mean * (1.0 - momentum)
        new_var = running_var * momentum + batch_var * (1.0 - momentum)
    else:
        new_mean, new_var = running_mean, running_var

    # TODO(synk): distributed async all_gather of features (dist.all_gather,
    # async_op=True) and multi-step gradient-accumulation stat merging have no
    # single-kernel Pallas equivalent; only the local-stats path is implemented.
    return y, new_mean, new_var


if __name__ == "__main__":
    key = jax.random.PRNGKey(0)
    kx, km, kv, kw, kb = jax.random.split(key, 5)

    B, C, H, W = 2, 4, 16, 16
    eps = 1e-5
    momentum = 0.9

    x = jax.random.normal(kx, (B, C, H, W), dtype=jnp.float32)

    # Deterministic (synthetic) parameters / buffers; shapes from __init__:
    #   mean: zeros(dim), var: ones(dim), weight: ones(dim), bias: zeros(dim)
    # Perturbed deterministically so the normalization is non-trivial.
    running_mean = 0.1 * jax.random.normal(km, (C,), dtype=jnp.float32)
    running_var = 1.0 + 0.1 * jax.random.uniform(kv, (C,), dtype=jnp.float32)
    weight = 1.0 + 0.1 * jax.random.normal(kw, (C,), dtype=jnp.float32)
    bias = 0.1 * jax.random.normal(kb, (C,), dtype=jnp.float32)

    y, new_mean, new_var = async_batchnorm_forward(
        x, running_mean, running_var, weight, bias,
        eps=eps, momentum=momentum, training=True)
    jax.block_until_ready((y, new_mean, new_var))

    # ---- pure-JAX reference ----
    inv = 1.0 / jnp.sqrt(running_var + eps)
    y_ref = ((x - running_mean[None, :, None, None])
             * inv[None, :, None, None]
             * weight[None, :, None, None]
             + bias[None, :, None, None])

    x_flat = jnp.transpose(x, (0, 2, 3, 1)).reshape(-1, C)
    bm_ref = x_flat.mean(axis=0)
    bv_ref = ((x_flat - bm_ref) ** 2).mean(axis=0)   # unbiased=False
    nm_ref = running_mean * momentum + bm_ref * (1.0 - momentum)
    nv_ref = running_var * momentum + bv_ref * (1.0 - momentum)

    assert jnp.allclose(y, y_ref, atol=1e-5, rtol=1e-5), "output mismatch"
    assert jnp.allclose(new_mean, nm_ref, atol=1e-5, rtol=1e-5), "mean mismatch"
    assert jnp.allclose(new_var, nv_ref, atol=1e-4, rtol=1e-4), "var mismatch"

    print("KERNEL_OK")
</pallas_src>

<mosaic_0001>
module attributes {stable_mosaic.version = 11 : i64} {
  func.func @_bn_kernel(%arg0: i32, %arg1: i32, %arg2: memref<1x4x256xf32, #tpu.memory_space<vmem>>, %arg3: memref<1x4x1xf32, #tpu.memory_space<vmem>>, %arg4: memref<1x4x1xf32, #tpu.memory_space<vmem>>, %arg5: memref<1x4x1xf32, #tpu.memory_space<vmem>>, %arg6: memref<1x4x256xf32, #tpu.memory_space<vmem>>, %arg7: memref<1x4x1xf32, #tpu.memory_space<vmem>>, %arg8: memref<1x4x1xf32, #tpu.memory_space<vmem>>) attributes {dimension_semantics = [#tpu.dimension_semantics<parallel>, #tpu.dimension_semantics<arbitrary>], iteration_bounds = array<i64: 2, 1>, scalar_prefetch = 0 : i64, scratch_operands = 0 : i64, tpu.core_type = #tpu.core_type<tc>, window_params = [{transform_indices = @transform_0, window_bounds = array<i64: 1, 4, 256>}, {pipeline_mode = #tpu.pipeline_mode<synchronous>, transform_indices = @transform_1, window_bounds = array<i64: 1, 4, 1>}, {pipeline_mode = #tpu.pipeline_mode<synchronous>, transform_indices = @transform_2, window_bounds = array<i64: 1, 4, 1>}, {pipeline_mode = #tpu.pipeline_mode<synchronous>, transform_indices = @transform_3, window_bounds = array<i64: 1, 4, 1>}, {transform_indices = @transform_4, window_bounds = array<i64: 1, 4, 256>}, {transform_indices = @transform_5, window_bounds = array<i64: 1, 4, 1>}, {transform_indices = @transform_6, window_bounds = array<i64: 1, 4, 1>}]} {
    %c0 = arith.constant 0 : index
    %c0_0 = arith.constant 0 : index
    %c0_1 = arith.constant 0 : index
    %0 = vector.load %arg2[%c0, %c0_0, %c0_1] : memref<1x4x256xf32, #tpu.memory_space<vmem>>, vector<1x4x256xf32>
    %c0_2 = arith.constant 0 : index
    %c0_3 = arith.constant 0 : index
    %c0_4 = arith.constant 0 : index
    %1 = vector.load %arg5[%c0_2, %c0_3, %c0_4] : memref<1x4x1xf32, #tpu.memory_space<vmem>>, vector<1x4x1xf32>
    %2 = vector.broadcast %1 : vector<1x4x1xf32> to vector<1x4x256xf32>
    %3 = arith.subf %0, %2 : vector<1x4x256xf32>
    %c0_5 = arith.constant 0 : index
    %c0_6 = arith.constant 0 : index
    %c0_7 = arith.constant 0 : index
    %4 = vector.load %arg3[%c0_5, %c0_6, %c0_7] : memref<1x4x1xf32, #tpu.memory_space<vmem>>, vector<1x4x1xf32>
    %5 = vector.broadcast %4 : vector<1x4x1xf32> to vector<1x4x256xf32>
    %6 = arith.mulf %3, %5 : vector<1x4x256xf32>
    %c0_8 = arith.constant 0 : index
    %c0_9 = arith.constant 0 : index
    %c0_10 = arith.constant 0 : index
    %7 = vector.load %arg4[%c0_8, %c0_9, %c0_10] : memref<1x4x1xf32, #tpu.memory_space<vmem>>, vector<1x4x1xf32>
    %8 = vector.broadcast %7 : vector<1x4x1xf32> to vector<1x4x256xf32>
    %9 = arith.addf %6, %8 : vector<1x4x256xf32>
    %c0_11 = arith.constant 0 : index
    %c0_12 = arith.constant 0 : index
    %c0_13 = arith.constant 0 : index
    %10 = vector.load %arg6[%c0_11, %c0_12, %c0_13] : memref<1x4x256xf32, #tpu.memory_space<vmem>>, vector<1x4x256xf32>
    tpu.vector_store %arg6[%c0_11, %c0_12, %c0_13], %9 {strides = array<i32>} : memref<1x4x256xf32, #tpu.memory_space<vmem>>, vector<1x4x256xf32>,
    %c0_i32 = arith.constant 0 : i32
    %11 = arith.cmpi eq, %arg1, %c0_i32 : i32
    %12 = arith.extui %11 : i1 to i32
    %c0_i32_14 = arith.constant 0 : i32
    %13 = arith.cmpi ne, %12, %c0_i32_14 : i32
    scf.if %13 {
      %cst_28 = arith.constant 0.000000e+00 : f32
      %25 = vector.broadcast %cst_28 : f32 to vector<1x4x1xf32>
      %c0_29 = arith.constant 0 : index
      %c0_30 = arith.constant 0 : index
      %c0_31 = arith.constant 0 : index
      %26 = vector.load %arg7[%c0_29, %c0_30, %c0_31] : memref<1x4x1xf32, #tpu.memory_space<vmem>>, vector<1x4x1xf32>
      tpu.vector_store %arg7[%c0_29, %c0_30, %c0_31], %25 {strides = array<i32>} : memref<1x4x1xf32, #tpu.memory_space<vmem>>, vector<1x4x1xf32>,
      %cst_32 = arith.constant 0.000000e+00 : f32
      %27 = vector.broadcast %cst_32 : f32 to vector<1x4x1xf32>
      %c0_33 = arith.constant 0 : index
      %c0_34 = arith.constant 0 : index
      %c0_35 = arith.constant 0 : index
      %28 = vector.load %arg8[%c0_33, %c0_34, %c0_35] : memref<1x4x1xf32, #tpu.memory_space<vmem>>, vector<1x4x1xf32>
      tpu.vector_store %arg8[%c0_33, %c0_34, %c0_35], %27 {strides = array<i32>} : memref<1x4x1xf32, #tpu.memory_space<vmem>>, vector<1x4x1xf32>,
    } else {
    }
    %c0_15 = arith.constant 0 : index
    %c0_16 = arith.constant 0 : index
    %c0_17 = arith.constant 0 : index
    %14 = vector.load %arg7[%c0_15, %c0_16, %c0_17] : memref<1x4x1xf32, #tpu.memory_space<vmem>>, vector<1x4x1xf32>
    %cst = arith.constant dense<0.000000e+00> : vector<1x4xf32>
    %15 = vector.multi_reduction <add>, %3, %cst [2] : vector<1x4x256xf32> to vector<1x4xf32>
    %16 = vector.shape_cast %15 : vector<1x4xf32> to vector<1x4x1xf32>
    %17 = arith.addf %14, %16 : vector<1x4x1xf32>
    %c0_18 = arith.constant 0 : index
    %c0_19 = arith.constant 0 : index
    %c0_20 = arith.constant 0 : index
    %18 = vector.load %arg7[%c0_18, %c0_19, %c0_20] : memref<1x4x1xf32, #tpu.memory_space<vmem>>, vector<1x4x1xf32>
    tpu.vector_store %arg7[%c0_18, %c0_19, %c0_20], %17 {strides = array<i32>} : memref<1x4x1xf32, #tpu.memory_space<vmem>>, vector<1x4x1xf32>,
    %c0_21 = arith.constant 0 : index
    %c0_22 = arith.constant 0 : index
    %c0_23 = arith.constant 0 : index
    %19 = vector.load %arg8[%c0_21, %c0_22, %c0_23] : memref<1x4x1xf32, #tpu.memory_space<vmem>>, vector<1x4x1xf32>
    %20 = arith.mulf %3, %3 : vector<1x4x256xf32>
    %cst_24 = arith.constant dense<0.000000e+00> : vector<1x4xf32>
    %21 = vector.multi_reduction <add>, %20, %cst_24 [2] : vector<1x4x256xf32> to vector<1x4xf32>
    %22 = vector.shape_cast %21 : vector<1x4xf32> to vector<1x4x1xf32>
    %23 = arith.addf %19, %22 : vector<1x4x1xf32>
    %c0_25 = arith.constant 0 : index
    %c0_26 = arith.constant 0 : index
    %c0_27 = arith.constant 0 : index
    %24 = vector.load %arg8[%c0_25, %c0_26, %c0_27] : memref<1x4x1xf32, #tpu.memory_space<vmem>>, vector<1x4x1xf32>
    tpu.vector_store %arg8[%c0_25, %c0_26, %c0_27], %23 {strides = array<i32>} : memref<1x4x1xf32, #tpu.memory_space<vmem>>, vector<1x4x1xf32>,
    return
  }
  func.func @transform_0(%arg0: i32, %arg1: i32) -> (i32, i32, i32) {
    %c0_i32 = arith.constant 0 : i32
    %c0_i32_0 = arith.constant 0 : i32
    return %arg0, %c0_i32, %arg1 : i32, i32, i32
  }
  func.func @transform_1(%arg0: i32, %arg1: i32) -> (i32, i32, i32) {
    %c0_i32 = arith.constant 0 : i32
    %c0_i32_0 = arith.constant 0 : i32
    %c0_i32_1 = arith.constant 0 : i32
    %c0_i32_2 = arith.constant 0 : i32
    return %c0_i32, %c0_i32_0, %c0_i32_1 : i32, i32, i32
  }
  func.func @transform_2(%arg0: i32, %arg1: i32) -> (i32, i32, i32) {
    %c0_i32 = arith.constant 0 : i32
    %c0_i32_0 = arith.constant 0 : i32
    %c0_i32_1 = arith.constant 0 : i32
    %c0_i32_2 = arith.constant 0 : i32
    return %c0_i32, %c0_i32_0, %c0_i32_1 : i32, i32, i32
  }
  func.func @transform_3(%arg0: i32, %arg1: i32) -> (i32, i32, i32) {
    %c0_i32 = arith.constant 0 : i32
    %c0_i32_0 = arith.constant 0 : i32
    %c0_i32_1 = arith.constant 0 : i32
    %c0_i32_2 = arith.constant 0 : i32
    return %c0_i32, %c0_i32_0, %c0_i32_1 : i32, i32, i32
  }
  func.func @transform_4(%arg0: i32, %arg1: i32) -> (i32, i32, i32) {
    %c0_i32 = arith.constant 0 : i32
    %c0_i32_0 = arith.constant 0 : i32
    return %arg0, %c0_i32, %arg1 : i32, i32, i32
  }
  func.func @transform_5(%arg0: i32, %arg1: i32) -> (i32, i32, i32) {
    %c0_i32 = arith.constant 0 : i32
    %c0_i32_0 = arith.constant 0 : i32
    %c0_i32_1 = arith.constant 0 : i32
    return %arg0, %c0_i32, %c0_i32_0 : i32, i32, i32
  }
  func.func @transform_6(%arg0: i32, %arg1: i32) -> (i32, i32, i32) {
    %c0_i32 = arith.constant 0 : i32
    %c0_i32_0 = arith.constant 0 : i32
    %c0_i32_1 = arith.constant 0 : i32
    return %arg0, %c0_i32, %c0_i32_0 : i32, i32, i32
  }
}

</mosaic_0001>

<bundles_post_ra>
// kernel: tpu_custom_call.1
= control target key start
LH: loop header
LB: loop body
LE: loop exit
PB: predicated region body
PF: predicated region fallthrough
CT: control target
= control target key end

     0   :  { %12 = vsyncpa [#allocation3], 0  ;;  %s951_s0 = inlined_call_operand.hbm [shape: f32[2,4,256], index: 0, kind: input, shape index: {}]   ;;  %s952_s1 = inlined_call_operand.vmem [shape: f32[1,4,1], index: 1, kind: input, shape index: {}]   ;;  %s953_s2 = inlined_call_operand.vmem [shape: f32[1,4,1], index: 2, kind: input, shape index: {}]   ;;  %s954_s3 = inlined_call_operand.vmem [shape: f32[1,4,1], index: 3, kind: input, shape index: {}]   ;;  %s955_s4 = inlined_call_operand.hbm [shape: f32[2,4,256], index: 4, kind: output, shape index: {0}]   ;;  %s956_s5 = inlined_call_operand.vmem [shape: f32[2,4,1], index: 5, kind: output, shape index: {1}]   ;;  %s957_s6 = inlined_call_operand.vmem [shape: f32[2,4,1], index: 6, kind: output, shape index: {2}]  }
   0x1   :  { %14 = vsyncpa [#allocation3 + $0x1], 0 }
   0x2   :  { %15 = vsyncpa [#allocation4], 0 }
   0x3   :  { %17 = vsyncpa [#allocation4 + $0x1], 0  ;;  %s784_s21 = smov 0   ;;  %s786_s22 = smov 0  }
   0x4   :  { %s788_s23 = smov 0   ;;  %s790_s24 = smov 0  }
   0x5   :  { %s792_s25 = smov 0   ;;  %s794_s26 = smov 0  }
   0x6 LB: > { %s548_s27 = sadd.s32 4294967295, %s742_s26   ;;  %s549_s28 = sadd.s32 4294967294, %s742_s26   ;;  %s742_s26 = sphi %s794_s26, %s23_s26   ;;  %s738_s25 = sphi %s792_s25, %s969_s25   ;;  %s734_s24 = sphi %s790_s24, %s968_s24   ;;  %s730_s23 = sphi %s788_s23, %s967_s23   ;;  %s726_s22 = sphi %s786_s22, %s966_s22   ;;  %s722_s21 = sphi %s784_s21, %s965_s21  }
   0x7   : > { %s35_s29 = sadd.s32 1, %s738_s25  ;;  %s44_s30 = sadd.s32 1, %s730_s23 }
   0x8   : > { %p37_p0 = scmp.ge.s32.totalorder %s35_s29, 2  ;;  %p51_p1 = scmp.ne.s32.totalorder %s730_s23, %s726_s22 }
   0x9   : > { %p52_p2 = scmp.eq.s32.totalorder %s742_s26, 0  ;;  %p57_p3 = scmp.ne.s32.totalorder %s726_s22, %s722_s21 }
   0xa   : > { %s971_s29 = smov (%p37_p0, %s35_s29), 0  ;;  %p58_p5 = scmp.eq.s32.totalorder %s548_s27, 0 }
   0xb   : > { %p825_p4 = por %p52_p2, %p51_p1  ;;  %s39_s8 = ssub.s32 %s738_s25, %s971_s29 }
   0xc   : > { %p146_p6 = scmp.eq.s32.totalorder %s548_s27, 1  ;;  %p42_p7 = scmp.eq.s32.totalorder %s39_s8, 0 }
   0xd   : > { %p831_p8 = por %p58_p5, %p57_p3  ;;  %p152_p10 = scmp.eq.s32.totalorder %s549_s28, 1 }
   0xe   : > { %p835_p9 = por %p146_p6, %p51_p1  ;;  %p579_p13 = scmp.lt.s32.totalorder %s742_s26, 2 }
   0xf   : > { %s840_s11 = scalar_select %p42_p7, %s730_s23, %s44_s30  }
  0x10   : > { %p842_p11 = por %p152_p10, %p57_p3  ;;  %s233_s13 = sand.u32 1, %s730_s23  }
  0x11   : > { %s552_s14 = sshll.u32 %s233_s13, 3  ;;  %s565_s15 = sshll.u32 %s738_s25, 7 }
  0x12   : > { %s961_s12 = scalar_select %p842_p11, 1, 0 }
  0x13   : > { %s245_s18 = scalar_lea.hbm %s951_s0, %s565_s15  ;;  %s237_s19 = scalar_lea.vmem [#allocation2], %s552_s14 }
  0x14   : > { %s247_s20 = sshll.u32 %s237_s19, 4  ;;  %p855_p0 = pnand %p579_p13, %p825_p4  ;;  %s248_s20 = int_to_ptr.vmem [resolvable:$true] %s247_s20 }
  0x15   : > { %p555_p1 = scmp.ge.s32.totalorder %s742_s26, 1  ;;  %p252_p2 = scmp.lt.s32.totalorder %s742_s26, 3 }
  0x16   : > { %s234_s28 = scalar_lea.sflag [#allocation3], %s233_s13  ;;  %p636_p3 = pneg %p855_p0 }
  0x17   : > { %s647_s30 = scalar_lea.vmem %s248_s20, 128  ;;  %s744_s8 = smov [#allocation2]  }
  0x18   : > { %p648_p5 = scmp.ne.s32.totalorder %s248_s20, %s647_s30  ;;  %s652_s15 = sshll.u32 %s744_s8, 4  ;;  %s653_s15 = int_to_ptr.vmem [resolvable:$false] %s652_s15 }
  0x19   : > { %s654_s14 = scalar_lea.vmem %s653_s15, 256  ;;  %p655_p10 = scmp.lt.s32.totalorder %s248_s20, %s653_s15 }
  0x1a   : > { %p650_p6 = pnand %p648_p5, %p636_p3  ;;  %p656_p12 = scmp.lt.s32.totalorder %s654_s14, %s647_s30 }
  0x1c   : > { %p651_p7 = pneg %p650_p6  ;;  %p657_p4 = por %p656_p12, %p655_p10 }
  0x1e   : > { %p658_p13 = pnand %p657_p4, %p651_p7 }
  0x20   : > { %661 = shalt.err (!%p658_p13)
}
  0x21   : > { %574 = dma.hbm_to_vmem [thread:$0]  (!%p855_p0), %s245_s18, 128, %s248_s20, %s234_s28  }
  0x22   : > { %p253_p11 = pnand %p555_p1, %p252_p2 }
  0x23   : > { %s870_s7 = sand.u32 (!%p253_p11), 1, %s726_s22  }
  0x24   : > { %256 = sbr.rel (%p253_p11) target bundleno = 338 (0x152), region = 36  ;;  %s556_s13 = sshll.u32 (!%p253_p11), %s870_s7, 3 }
  0x25   : > { %s259_s16 = scalar_lea.sflag (!%p253_p11), [#allocation3], %s870_s7  ;;  %s262_s17 = scalar_lea.vmem (!%p253_p11), [#allocation2], %s556_s13 }
  0x29   : > { %713 = dma.done.wait (%p831_p8), %s259_s16, 128  }
  0x2a   : > { %715 = vsyncadd (%p831_p8), %s259_s16, 4294967168  ;;  %v745_v0 = vmov 0   ;;  %v310_v1 = vld [vmem:[%s954_s3] sm:$0xf]  ;;  %p301_p11 = scmp.lt.s32.totalorder %s734_s24, 1  ;;  %vm357_vm0 = vcmask 3072   ;;  %v318_v6 = vlaneseq }
  0x2b   : > { %632 = vset.pattern.permute.xlu0 %v745_v0  ;;  %633 = vset.pattern.permute.xlu1 %v745_v0  ;;  %v324_v2 = vld [vmem:[%s952_s1] sm:$0xf]  ;;  %v746_v3 = vmov 0.0   ;;  %v747_v4 = vmov 839922192   ;;  %vm364_vm1 = vcmask 1043456  }
  0x2c   : > { %313 = vperm.xlu0 %632, %v310_v1   ;;  %327 = vperm.xlu1 %633, %v324_v2   ;;  %s888_s28 = scalar_select %p301_p11, %s734_s24, 1  ;;  %v316_v5 = vunpack.c.l.s4 %v747_v4  ;;  %v319_v8 = vshrl.u32 %v318_v6, 7  ;;  %v309_v11 = vld [vmem:[%s262_s17] sm:$0xff] }
  0x2d   : > { %v338_v23 = vld [vmem:[%s953_s2] sm:$0xf]  ;;  %s566_s20 = sshll.u32 %s734_s24, 7  ;;  %s286_s27 = scalar_lea.vmem [#allocation5], %s556_s13 }
  0x2e   : > { %s558_s9 = sshll.u32 %s888_s28, 2  ;;  %v317_v7 = vunpack.c.0.s8 %v316_v5  ;;  %s410_s28 = sshll.u32 %s286_s27, 4  ;;  %s411_s28 = int_to_ptr.vmem [resolvable:$true] %s410_s28 }
  0x2f   : > { %s894_s15 = scalar_lea.vmem %s956_s5, %s558_s9  ;;  %s308_s17 = scalar_lea.vmem %s957_s6, %s558_s9 }
  0x30   : > { %358 = vst.msk [vmem:[%s894_s15] sm:$0xf] %vm357_vm0, %v746_v3  ;;  %v320_v9 = vsub.s32 %v317_v7, %v319_v8  ;;  %359 = vst.msk [vmem:[%s308_s17] sm:$0xf] %vm357_vm0, %v746_v3  ;;  %s408_s8 = scalar_lea.hbm %s955_s4, %s566_s20  ;;  %s386_s14 = scalar_lea.sflag [#allocation4], %s870_s7 }
  0x31   : > { %s748_s16 = smov [#allocation5]  }
  0x32   : > { %s666_s24 = sshll.u32 %s748_s16, 4  ;;  %s667_s24 = int_to_ptr.vmem [resolvable:$false] %s666_s24 }
  0x33   : > { %s668_s13 = scalar_lea.vmem %s667_s24, 256  ;;  %p669_p1 = scmp.lt.s32.totalorder %s411_s28, %s667_s24 }
  0x37   : > { %v360_v25 = vld [vmem:[%s894_s15] sm:$0xf] }
  0x38   : > { %v373_v27 = vld [vmem:[%s308_s17] sm:$0xf] }
  0xa7   : > { %v314_v10 = vpop.permute.xlu0 %313  ;;  %v328_v24 = vpop.permute.xlu1 %327 }
  0xa8   : > { %v321_v12 = vrot.slane %v314_v10, %v320_v9  ;;  %v335_v30 = vrot.slane %v328_v24, %v320_v9 }
  0xaa   : > { %v323_v13 = vsub.f32 %v309_v11, %v321_v12 }
  0xac   : > { %v362_v14 = vcombine.high %v323_v13, %v323_v13  ;;  %v374_v15 = vmul.f32 %v323_v13, %v323_v13  ;;  %v365_v16 = vsel %vm364_vm1, %v323_v13, 0.0  ;;  %v337_v33 = vmul.f32 %v335_v30, %v323_v13 }
  0xae   : > { %v366_v17 = vsel %vm364_vm1, %v362_v14, 0.0  ;;  %v376_v18 = vcombine.high %v374_v15, %v374_v15  ;;  %v378_v20 = vsel %vm364_vm1, %v374_v15, 0.0 }
  0xaf   : > { %v367_v19 = vadd.f32 %v366_v17, %v365_v16 }
  0xb0   : > { %v379_v21 = vsel %vm364_vm1, %v376_v18, 0.0 }
  0xb1   : > { %368 = vadd.xlane.f32.xlu0 %v367_v19  ;;  %v380_v22 = vadd.f32 %v379_v21, %v378_v20 }
  0xb3   : > { %381 = vadd.xlane.f32.xlu1 %v380_v22 }
  0xc4   : > { %341 = vperm.xlu1 %633, %v338_v23  }
 0x13a   : > { %v369_v26 = vpop.xlane.xlu0 %368 }
 0x13b   : > { %v370_v28 = vadd.f32 %v369_v26, %v360_v25 }
 0x13c   : > { %v382_v29 = vpop.xlane.xlu1 %381 }
 0x13d   : > { %372 = vst.msk [vmem:[%s894_s15] sm:$0xf] %vm357_vm0, %v370_v28  ;;  %v383_v31 = vadd.f32 %v382_v29, %v373_v27  ;;  %s662_s15 = scalar_lea.vmem %s411_s28, 128 }
 0x13e   : > { %p663_p8 = scmp.ne.s32.totalorder %s411_s28, %s662_s15  ;;  %p670_p2 = scmp.lt.s32.totalorder %s668_s13, %s662_s15 }
 0x13f   : > { %384 = vst.msk [vmem:[%s308_s17] sm:$0xf] %vm357_vm0, %v383_v31 }
 0x140   : > { %v342_v32 = vpop.permute.xlu1 %341  ;;  %p664_p12 = pnand %p663_p8, %p835_p9  ;;  %p671_p3 = por %p670_p2, %p669_p1 }
 0x141   : > { %v349_v34 = vrot.slane %v342_v32, %v320_v9 }
 0x142   : > { %p665_p0 = pneg %p664_p12 }
 0x143   : > { %v351_v35 = vadd.f32 %v349_v34, %v337_v33 }
 0x144   : > { %p672_p5 = pnand %p671_p3, %p665_p0 }
 0x145   : > { %352 = vst [vmem:[%s286_s27] sm:$0xff] %v351_v35 }
 0x146   : > { %675 = shalt.err (!%p672_p5)
}
 0x147   : > { %s676_s17 = scalar_lea.hbm %s408_s8, 128  ;;  %s680_s19 = scalar_lea.hbm %s955_s4, 256 }
 0x148   : > { %p677_p6 = scmp.ne.s32.totalorder %s408_s8, %s676_s17  ;;  %p681_p4 = scmp.lt.s32.totalorder %s408_s8, %s955_s4 }
 0x149   : > { %p682_p13 = scmp.lt.s32.totalorder %s680_s19, %s676_s17 }
 0x14a   : > { %p678_p7 = pnand %p677_p6, %p835_p9 }
 0x14b   : > { %p683_p11 = por %p682_p13, %p681_p4 }
 0x14c   : > { %p679_p10 = pneg %p678_p7 }
 0x14e   : > { %p684_p8 = pnand %p683_p11, %p679_p10 }
 0x150   : > { %687 = shalt.err (!%p684_p8)
}
 0x151   : > { %569 = dma.vmem_to_hbm [thread:$0]  (%p835_p9), %s411_s28, 128, %s408_s8, %s386_s14  }
 0x152 PF: > { %s428_s9 = sand.u32 1, %s722_s21   ;;  %p963_p12 = scmp.ne.s32.totalorder %s961_s12, 0 }
 0x153   : > { %p964_p0 = scmp.ge.s32.totalorder %s742_s26, 2  ;;  %s429_s30 = scalar_lea.sflag [#allocation4], %s428_s9 }
 0x155   : > { %p576_p1 = pnand %p964_p0, %p963_p12 }
 0x157   : > { %p577_p2 = pneg %p576_p1 }
 0x159   : > { %717 = dma.done.wait (%p577_p2), %s429_s30, 128  }
 0x15a   : > { %719 = vsyncadd (%p577_p2), %s429_s30, 4294967168  ;;  %s23_s26 = sadd.s32 1, %s742_s26   ;;  %s965_s21 = smov %s726_s22 }
 0x15b   : > { %p20_p3 = scmp.ge.s32.totalorder %s23_s26, 4   ;;  %s966_s22 = smov %s730_s23 }
 0x15c   : > { %s967_s23 = smov %s840_s11  ;;  %s968_s24 = smov %s738_s25 }
 0x15d   : > { %s969_s25 = smov %s971_s29  ;;  %22 = sbr.rel (!%p20_p3) target bundleno = 6 (0x6), region = 109 }
 0x162   :  { %448 = vsyncpa [#allocation3], 1 }
 0x163   :  { %450 = vsyncpa [#allocation3 + $0x1], 1 }
 0x164   :  { %451 = vsyncpa [#allocation4], 1 }
 0x165   :  { %453 = vsyncpa [#allocation4 + $0x1], 1 }

</bundles_post_ra>
